<compile_context>
chip_gen: v5e
topology: v5e:2x2
jax: 0.10.0
libtpu: 0.0.40
codegen_flags: <defaults>
</compile_context>

<pallas_src>
import numpy as np
import jax
import jax.numpy as jnp
from jax.experimental import pallas as pl
from jax.experimental.pallas import tpu as pltpu


# ----------------------------------------------------------------------------
# numpy glue: build the static resize / crop / flip operators.
# ----------------------------------------------------------------------------
def _bilinear_antialias_matrix(in_size: int, out_size: int) -> np.ndarray:
    """PIL / torchvision (antialias=True) separable bilinear weights.
    Returns M of shape (out_size, in_size) so that out = M @ in along that axis."""
    M = np.zeros((out_size, in_size), dtype=np.float64)
    scale = in_size / out_size
    filterscale = max(scale, 1.0)
    support = 1.0 * filterscale  # bilinear filter support = 1
    for i in range(out_size):
        center = (i + 0.5) * scale
        xmin = max(int(center - support + 0.5), 0)
        xmax = min(int(center + support + 0.5), in_size)
        xs = np.arange(xmin, xmax, dtype=np.float64)
        w = 1.0 - np.abs((xs + 0.5 - center) / filterscale)
        w = np.clip(w, 0.0, None)
        s = w.sum()
        if s > 0:
            w = w / s
        M[i, xmin:xmax] = w
    return M


def _nearest_indices(in_size: int, out_size: int) -> np.ndarray:
    """torch 'nearest' (floor) resize source indices, shape (out_size,)."""
    return np.minimum(
        np.floor(np.arange(out_size) * (in_size / out_size)).astype(np.int64),
        in_size - 1,
    )


def _nearest_matrix(in_size: int, out_size: int) -> np.ndarray:
    """torch 'nearest' resize as a one-hot matrix (out_size, in_size) (reference only)."""
    M = np.zeros((out_size, in_size), dtype=np.float64)
    M[np.arange(out_size), _nearest_indices(in_size, out_size)] = 1.0
    return M


def _round_up(x: int, m: int) -> int:
    return ((x + m - 1) // m) * m


def build_transform_ops(img_hw, seg_hw, train_resolution):
    """Fold Resize(bilinear+antialias) -> segmap nearest resize ->
    RandomHorizontalFlip -> CenterCropOrPadSides -> /127.5 into static operators.

    Returns a dict with f32 numpy operator matrices (B_img stacked
    [no-flip, flip] and zero-padded to a lane-dense output width) plus the
    segmap index-select vectors for the landscape branch."""
    H_in, W_in = img_hw
    H_s, W_s = seg_hw

    # torchvision T.Resize(int): smaller edge -> size, other edge scaled.
    # TODO(synk): recent torchvision rounds the long edge; int() truncation kept.
    if H_in <= W_in:
        h = train_resolution
        w = int(train_resolution * W_in / H_in)
    else:
        w = train_resolution
        h = int(train_resolution * H_in / W_in)

    Rh1 = _bilinear_antialias_matrix(H_in, h)           # (h, H_in)
    Cw1 = _bilinear_antialias_matrix(W_in, w).T         # (W_in, w)
    Rh1s = _nearest_matrix(H_s, h)                      # (h, H_s)   (reference)
    Cw1s = _nearest_matrix(W_s, w).T                    # (W_s, w)   (reference)

    portrait = h > w
    seg_row_idx = None
    seg_col_idx = None
    if portrait:
        # pad width by (h-w)//2 per side, then bilinear+antialias resize -> (w, w).
        padding = (h - w) // 2
        Wp = w + 2 * padding
        E = np.zeros((w, Wp), dtype=np.float64)          # zero-pad embedding
        E[np.arange(w), np.arange(w) + padding] = 1.0
        Rh2 = _bilinear_antialias_matrix(h, w)           # (w, h)
        Cw2 = _bilinear_antialias_matrix(Wp, w).T        # (Wp, w)
        width_post = E @ Cw2                             # (w, w)
        A_img = Rh2 @ Rh1
        A_seg = Rh2 @ Rh1s
        B_img0 = Cw1 @ width_post
        B_img1 = Cw1[:, ::-1] @ width_post
        B_seg0 = Cw1s @ width_post
        B_seg1 = Cw1s[:, ::-1] @ width_post
        out_hw = (w, w)
    else:
        # center crop the width down to h.
        padding = (w - h) // 2
        A_img = Rh1
        A_seg = Rh1s
        B_img0 = Cw1[:, padding:padding + h]
        B_img1 = Cw1[:, ::-1][:, padding:padding + h]
        B_seg0 = Cw1s[:, padding:padding + h]
        B_seg1 = Cw1s[:, ::-1][:, padding:padding + h]
        out_hw = (h, h)
        # Landscape segmap path == pure index-select (nearest + flip + crop).
        ci = _nearest_indices(W_s, w)
        seg_row_idx = _nearest_indices(H_s, h)                       # (out_h,)
        seg_col_idx = np.stack([ci[padding:padding + h],             # no-flip
                                ci[::-1][padding:padding + h]])      # flip

    # Fold 1/127.5 into the image row operator (only "- 1.0" stays in-kernel).
    A_img = A_img * (1.0 / 127.5)

    # Lane-dense output: pad B_img columns with zeros up to a multiple of 128;
    # the wrapper slices the pad off the kernel output.
    out_h, out_w = out_hw
    out_w_pad = _round_up(out_w, 128)
    B_img = np.stack([B_img0, B_img1])                   # (2, W_in, out_w)
    if out_w_pad != out_w:
        pad = np.zeros((2, B_img.shape[1], out_w_pad - out_w), dtype=B_img.dtype)
        B_img = np.concatenate([B_img, pad], axis=-1)

    f32 = lambda a: np.ascontiguousarray(a, dtype=np.float32)
    return {
        "A_img": f32(A_img),                             # (out_h, H_in), scale folded
        "B_img": f32(B_img),                             # (2, W_in, out_w_pad)
        "A_seg": f32(A_seg),                             # (out_h, H_s)  (reference / portrait)
        "B_seg": f32(np.stack([B_seg0, B_seg1])),        # (2, W_s, out_w)
        "out_hw": out_hw,
        "out_w_pad": out_w_pad,
        "portrait": portrait,
        "seg_row_idx": seg_row_idx,
        "seg_col_idx": seg_col_idx,
    }


# ----------------------------------------------------------------------------
# Pallas image kernel
# ----------------------------------------------------------------------------
def _make_image_kernel(cb: int, contract_w_first: bool):
    def kernel(flag_ref, img_ref, a_ref, b_ref, out_ref):
        del flag_ref  # flip already resolved in B's index_map (scalar prefetch)
        a = a_ref[...]            # (tile_h, H_in) bf16
        b = b_ref[0]              # (W_in, out_w_pad) bf16, single flip variant
        for c in range(cb):       # static unroll; cb==1 (production) or C (toy)
            # uint8 -> f32 -> bf16 (0..255 exact in bf16).
            x = img_ref[c].astype(jnp.float32).astype(jnp.bfloat16)   # (H_in, W_in)
            if contract_w_first:  # A @ (x @ B): cheaper for wide landscape inputs
                t = jnp.dot(x, b, preferred_element_type=jnp.float32)
                y = jnp.dot(a, t.astype(jnp.bfloat16),
                            preferred_element_type=jnp.float32)
            else:                 # (A @ x) @ B
                t = jnp.dot(a, x, preferred_element_type=jnp.float32)
                y = jnp.dot(t.astype(jnp.bfloat16), b,
                            preferred_element_type=jnp.float32)
            out_ref[c] = (y - 1.0).astype(out_ref.dtype)  # 1/127.5 folded into A
    return kernel


def _vmem_budget(block_bytes, headroom=4 << 20):
    """Generation-aware VMEM request: double-buffered blocks + headroom,
    clamped to 90% of the chip's physical VMEM (128 MiB v5e/v6e, 64 MiB v7x)."""
    need = 2 * sum(int(b) for b in block_bytes) + headroom
    try:
        cap = int(getattr(pltpu.get_tpu_info(), "vmem_capacity_bytes", 64 << 20))
    except Exception:
        cap = 64 << 20
    return int(min(max(need, 16 << 20), int(cap * 0.9)))


def train_transform_with_segmap(image_u8, segmap, flip_flag, ops,
                                out_dtype=jnp.float32):
    """image_u8: (C, H_in, W_in) uint8; segmap: (H_s, W_s); flip_flag: int32[1]
    in {0,1}; ops: dict from build_transform_ops.
    Returns (image_out (C,out_h,out_w) out_dtype in [-1,1], segmap_out (out_h,out_w))."""
    C, H_in, W_in = image_u8.shape
    out_h, out_w = ops["out_hw"]
    out_w_pad = ops["out_w_pad"]

    # bf16 weights (small, grid-invariant); intentionally quantized - the one-hot
    # / antialias taps lose <0.5% rel., acceptable for image preprocessing.
    A_img = jnp.asarray(ops["A_img"], dtype=jnp.bfloat16)      # (out_h, H_in)
    B_img = jnp.asarray(ops["B_img"], dtype=jnp.bfloat16)      # (2, W_in, out_w_pad)

    # ---- tiling decisions (all static) --------------------------------------
    # Row-tile out_h for big outputs so grid >> 2 (v7x megacore balance).
    # TODO(synk): per-generation tile_h (128 on v5e's 4x128 MXU, 256 on v6e/v7x).
    if out_h > 512 and out_h % 256 == 0:
        tile_h = 256
    elif out_h > 512 and out_h % 128 == 0:
        tile_h = 128
    else:
        tile_h = out_h
    nh = out_h // tile_h

    # Toy/small configs: collapse the channel grid into one step (C unrolled
    # dot chains, no per-step grid overhead). Production: one channel per step
    # so channel c+1's DMA overlaps channel c's matmuls.
    in_bytes = C * H_in * W_in * image_u8.dtype.itemsize
    cb = C if (nh == 1 and in_bytes <= (2 << 20)) else 1
    nc = C // cb

    # Pick the matmul association from the (padded) FLOP counts.
    fl_ax_first = out_h * H_in * W_in + out_h * W_in * out_w_pad
    fl_xb_first = H_in * W_in * out_w_pad + out_h * H_in * out_w_pad
    contract_w_first = (nh == 1) and (fl_xb_first < fl_ax_first)

    grid_spec = pltpu.PrefetchScalarGridSpec(
        num_scalar_prefetch=1,
        grid=(nc, nh),
        in_specs=[
            # uint8 image block; same channel block reused across row tiles.
            pl.BlockSpec((cb, H_in, W_in), lambda ci, rh, flag: (ci, 0, 0)),
            # row-tiled A (grid-invariant across channels).
            pl.BlockSpec((tile_h, H_in), lambda ci, rh, flag: (rh, 0)),
            # flip variant chosen by the prefetched flag -> only one copy DMA'd.
            pl.BlockSpec((1, W_in, out_w_pad), lambda ci, rh, flag: (flag[0], 0, 0)),
        ],
        out_specs=pl.BlockSpec((cb, tile_h, out_w_pad),
                               lambda ci, rh, flag: (ci, rh, 0)),
    )

    vmem = _vmem_budget([
        cb * H_in * W_in * image_u8.dtype.itemsize,     # uint8 input block
        tile_h * H_in * 2,                              # bf16 A tile
        W_in * out_w_pad * 2,                           # bf16 B (single flip variant)
        cb * tile_h * out_w_pad * jnp.dtype(out_dtype).itemsize,   # output block
    ])

    img_out = pl.pallas_call(
        _make_image_kernel(cb, contract_w_first),
        grid_spec=grid_spec,
        out_shape=jax.ShapeDtypeStruct((C, out_h, out_w_pad), out_dtype),
        compiler_params=pltpu.CompilerParams(
            dimension_semantics=("parallel", "parallel"),   # megacore on v7x
            vmem_limit_bytes=vmem,
        ),
    )(flip_flag, image_u8, A_img, B_img)

    if out_w_pad != out_w:
        img_out = img_out[:, :, :out_w]   # drop the lane-padding columns

    # ---- segmap --------------------------------------------------------------
    if ops["portrait"]:
        # Portrait: the original torch code bilinearly resizes the padded
        # image+segmap concat, so the segmap is NOT a pure index-select here.
        # TODO(synk): tiny dense jnp einsum with the folded operators; not worth
        #             a Pallas kernel at these sizes.
        A_seg = jnp.asarray(ops["A_seg"], jnp.float32)
        B_seg = jnp.asarray(ops["B_seg"], jnp.float32)
        b_s = jnp.where(flip_flag[0] > 0, B_seg[1], B_seg[0])
        seg_out = A_seg @ segmap.astype(jnp.float32) @ b_s
    else:
        # Landscape: nearest resize + flip + center-crop == static index-select.
        # Plain gather (perf review: drop the dense one-hot matmul pallas_call);
        # preserves the segmap dtype / label values exactly.
        row_idx = jnp.asarray(ops["seg_row_idx"], jnp.int32)          # (out_h,)
        col_sel = jnp.asarray(ops["seg_col_idx"], jnp.int32)          # (2, out_w)
        col_idx = jnp.where(flip_flag[0] > 0, col_sel[1], col_sel[0])
        seg_out = jnp.take(jnp.take(segmap, row_idx, axis=0), col_idx, axis=1)

    return img_out, seg_out


# ----------------------------------------------------------------------------
# Pure-JAX f32 reference (same folded operators) for the correctness check.
# ----------------------------------------------------------------------------
def reference(image_u8, segmap, flip_bool, ops):
    out_h, out_w = ops["out_hw"]
    idx = 1 if flip_bool else 0
    A = jnp.asarray(ops["A_img"], jnp.float32)                       # scale folded
    B = jnp.asarray(ops["B_img"], jnp.float32)[idx][:, :out_w]
    img = jnp.einsum('oh,chw,wp->cop', A, image_u8.astype(jnp.float32), B) - 1.0
    A_s = jnp.asarray(ops["A_seg"], jnp.float32)
    B_s = jnp.asarray(ops["B_seg"], jnp.float32)[idx]
    seg = A_s @ segmap.astype(jnp.float32) @ B_s
    return img, seg


if __name__ == "__main__":
    key = jax.random.PRNGKey(0)
    k_img, k_seg, k_flip = jax.random.split(key, 3)

    # image (3, 32, 48) uint8, segmap (64, 96) integer labels stored as f32.
    # train_resolution=16 -> Resize: (3,16,24); segmap nearest -> (16,24);
    # h <= w -> center crop the width -> output 16x16 (lane-padded to 128 in-kernel).
    image = jax.random.randint(k_img, (3, 32, 48), 0, 256, dtype=jnp.int32).astype(jnp.uint8)
    segmap = jax.random.randint(k_seg, (64, 96), 0, 10, dtype=jnp.int32).astype(jnp.float32)

    # RandomHorizontalFlip(p=0.5) decision (deterministic given PRNGKey(0)).
    # TODO(synk): torch-side RNG for the flip is not reproduced; a jax.random
    #             decision is passed to the kernel as a scalar-prefetch flag.
    flip_bool = bool(jax.random.bernoulli(k_flip, 0.5))
    flip_flag = jnp.array([1 if flip_bool else 0], dtype=jnp.int32)

    ops = build_transform_ops(img_hw=(32, 48), seg_hw=(64, 96), train_resolution=16)
    out_h, out_w = ops["out_hw"]

    img_out, seg_out = train_transform_with_segmap(image, segmap, flip_flag, ops)
    img_out = jax.block_until_ready(img_out)
    seg_out = jax.block_until_ready(seg_out)

    img_ref, seg_ref = reference(image, segmap, flip_bool, ops)

    assert img_out.shape == (3, out_h, out_w), img_out.shape
    assert seg_out.shape == (out_h, out_w), seg_out.shape
    # bf16 weights/activations in the kernel vs f32 reference -> relaxed
    # (intentional) tolerance for the image; the segmap gather is exact.
    assert jnp.allclose(img_out, img_ref, rtol=0.0, atol=5e-2), \
        float(jnp.max(jnp.abs(img_out - img_ref)))
    assert jnp.allclose(seg_out, seg_ref, rtol=0.0, atol=1e-5), \
        float(jnp.max(jnp.abs(seg_out - seg_ref)))

    # TODO(synk): torch's uint8 fixed-point antialias resize arithmetic is not
    # reproduced bit-exactly; float separable weights are used instead.
    print("KERNEL_OK")
</pallas_src>

<mosaic_0001>
module attributes {stable_mosaic.version = 11 : i64} {
  func.func @kernel(%arg0: i32, %arg1: i32, %arg2: memref<1xi32, #tpu.memory_space<smem>>, %arg3: memref<3x32x48xi8, #tpu.memory_space<vmem>>, %arg4: memref<16x32xbf16, #tpu.memory_space<vmem>>, %arg5: memref<1x48x128xbf16, #tpu.memory_space<vmem>>, %arg6: memref<3x16x128xf32, #tpu.memory_space<vmem>>) attributes {dimension_semantics = [#tpu.dimension_semantics<parallel>, #tpu.dimension_semantics<parallel>], iteration_bounds = array<i64: 1, 1>, scalar_prefetch = 1 : i64, scratch_operands = 0 : i64, tpu.core_type = #tpu.core_type<tc>, window_params = [{transform_indices = @transform_0, window_bounds = array<i64: 3, 32, 48>}, {transform_indices = @transform_1, window_bounds = array<i64: 16, 32>}, {transform_indices = @transform_2, window_bounds = array<i64: 1, 48, 128>}, {transform_indices = @transform_3, window_bounds = array<i64: 3, 16, 128>}]} {
    %c0 = arith.constant 0 : index
    %c0_0 = arith.constant 0 : index
    %0 = vector.load %arg4[%c0, %c0_0] : memref<16x32xbf16, #tpu.memory_space<vmem>>, vector<16x32xbf16>
    %c0_1 = arith.constant 0 : index
    %c0_2 = arith.constant 0 : index
    %c0_3 = arith.constant 0 : index
    %1 = vector.load %arg5[%c0_1, %c0_2, %c0_3] : memref<1x48x128xbf16, #tpu.memory_space<vmem>>, vector<1x48x128xbf16>
    %2 = vector.shape_cast %1 : vector<1x48x128xbf16> to vector<48x128xbf16>
    %c0_4 = arith.constant 0 : index
    %c0_5 = arith.constant 0 : index
    %c0_6 = arith.constant 0 : index
    %3 = vector.load %arg3[%c0_4, %c0_5, %c0_6] : memref<3x32x48xi8, #tpu.memory_space<vmem>>, vector<1x32x48xi8>
    %4 = vector.shape_cast %3 : vector<1x32x48xi8> to vector<32x48xi8>
    %5 = arith.uitofp %4 : vector<32x48xi8> to vector<32x48xf32>
    %6 = arith.truncf %5 : vector<32x48xf32> to vector<32x48xbf16>
    %cst = arith.constant dense<0.000000e+00> : vector<16x48xf32>
    %7 = tpu.matmul %0, %6, %cst {dimension_numbers = #tpu.dot_dimension_numbers<[1], [0], [0], [1], [0, 0, 1, 1], [], []>} : vector<16x32xbf16>, vector<32x48xbf16>, vector<16x48xf32> -> vector<16x48xf32>
    %8 = arith.truncf %7 : vector<16x48xf32> to vector<16x48xbf16>
    %cst_7 = arith.constant dense<0.000000e+00> : vector<16x128xf32>
    %9 = tpu.matmul %8, %2, %cst_7 {dimension_numbers = #tpu.dot_dimension_numbers<[1], [0], [0], [1], [0, 0, 1, 1], [], []>} : vector<16x48xbf16>, vector<48x128xbf16>, vector<16x128xf32> -> vector<16x128xf32>
    %cst_8 = arith.constant 1.000000e+00 : f32
    %10 = vector.broadcast %cst_8 : f32 to vector<16x128xf32>
    %11 = arith.subf %9, %10 : vector<16x128xf32>
    %c0_9 = arith.constant 0 : index
    %c0_10 = arith.constant 0 : index
    %c0_11 = arith.constant 0 : index
    %12 = vector.load %arg6[%c0_9, %c0_10, %c0_11] : memref<3x16x128xf32, #tpu.memory_space<vmem>>, vector<1x16x128xf32>
    %13 = vector.shape_cast %12 : vector<1x16x128xf32> to vector<16x128xf32>
    %14 = vector.shape_cast %11 : vector<16x128xf32> to vector<1x16x128xf32>
    tpu.vector_store %arg6[%c0_9, %c0_10, %c0_11], %14 {strides = array<i32>} : memref<3x16x128xf32, #tpu.memory_space<vmem>>, vector<1x16x128xf32>,
    %c1 = arith.constant 1 : index
    %c0_12 = arith.constant 0 : index
    %c0_13 = arith.constant 0 : index
    %15 = vector.load %arg3[%c1, %c0_12, %c0_13] : memref<3x32x48xi8, #tpu.memory_space<vmem>>, vector<1x32x48xi8>
    %16 = vector.shape_cast %15 : vector<1x32x48xi8> to vector<32x48xi8>
    %17 = arith.uitofp %16 : vector<32x48xi8> to vector<32x48xf32>
    %18 = arith.truncf %17 : vector<32x48xf32> to vector<32x48xbf16>
    %cst_14 = arith.constant dense<0.000000e+00> : vector<16x48xf32>
    %19 = tpu.matmul %0, %18, %cst_14 {dimension_numbers = #tpu.dot_dimension_numbers<[1], [0], [0], [1], [0, 0, 1, 1], [], []>} : vector<16x32xbf16>, vector<32x48xbf16>, vector<16x48xf32> -> vector<16x48xf32>
    %20 = arith.truncf %19 : vector<16x48xf32> to vector<16x48xbf16>
    %cst_15 = arith.constant dense<0.000000e+00> : vector<16x128xf32>
    %21 = tpu.matmul %20, %2, %cst_15 {dimension_numbers = #tpu.dot_dimension_numbers<[1], [0], [0], [1], [0, 0, 1, 1], [], []>} : vector<16x48xbf16>, vector<48x128xbf16>, vector<16x128xf32> -> vector<16x128xf32>
    %cst_16 = arith.constant 1.000000e+00 : f32
    %22 = vector.broadcast %cst_16 : f32 to vector<16x128xf32>
    %23 = arith.subf %21, %22 : vector<16x128xf32>
    %c1_17 = arith.constant 1 : index
    %c0_18 = arith.constant 0 : index
    %c0_19 = arith.constant 0 : index
    %24 = vector.load %arg6[%c1_17, %c0_18, %c0_19] : memref<3x16x128xf32, #tpu.memory_space<vmem>>, vector<1x16x128xf32>
    %25 = vector.shape_cast %24 : vector<1x16x128xf32> to vector<16x128xf32>
    %26 = vector.shape_cast %23 : vector<16x128xf32> to vector<1x16x128xf32>
    tpu.vector_store %arg6[%c1_17, %c0_18, %c0_19], %26 {strides = array<i32>} : memref<3x16x128xf32, #tpu.memory_space<vmem>>, vector<1x16x128xf32>,
    %c2 = arith.constant 2 : index
    %c0_20 = arith.constant 0 : index
    %c0_21 = arith.constant 0 : index
    %27 = vector.load %arg3[%c2, %c0_20, %c0_21] : memref<3x32x48xi8, #tpu.memory_space<vmem>>, vector<1x32x48xi8>
    %28 = vector.shape_cast %27 : vector<1x32x48xi8> to vector<32x48xi8>
    %29 = arith.uitofp %28 : vector<32x48xi8> to vector<32x48xf32>
    %30 = arith.truncf %29 : vector<32x48xf32> to vector<32x48xbf16>
    %cst_22 = arith.constant dense<0.000000e+00> : vector<16x48xf32>
    %31 = tpu.matmul %0, %30, %cst_22 {dimension_numbers = #tpu.dot_dimension_numbers<[1], [0], [0], [1], [0, 0, 1, 1], [], []>} : vector<16x32xbf16>, vector<32x48xbf16>, vector<16x48xf32> -> vector<16x48xf32>
    %32 = arith.truncf %31 : vector<16x48xf32> to vector<16x48xbf16>
    %cst_23 = arith.constant dense<0.000000e+00> : vector<16x128xf32>
    %33 = tpu.matmul %32, %2, %cst_23 {dimension_numbers = #tpu.dot_dimension_numbers<[1], [0], [0], [1], [0, 0, 1, 1], [], []>} : vector<16x48xbf16>, vector<48x128xbf16>, vector<16x128xf32> -> vector<16x128xf32>
    %cst_24 = arith.constant 1.000000e+00 : f32
    %34 = vector.broadcast %cst_24 : f32 to vector<16x128xf32>
    %35 = arith.subf %33, %34 : vector<16x128xf32>
    %c2_25 = arith.constant 2 : index
    %c0_26 = arith.constant 0 : index
    %c0_27 = arith.constant 0 : index
    %36 = vector.load %arg6[%c2_25, %c0_26, %c0_27] : memref<3x16x128xf32, #tpu.memory_space<vmem>>, vector<1x16x128xf32>
    %37 = vector.shape_cast %36 : vector<1x16x128xf32> to vector<16x128xf32>
    %38 = vector.shape_cast %35 : vector<16x128xf32> to vector<1x16x128xf32>
    tpu.vector_store %arg6[%c2_25, %c0_26, %c0_27], %38 {strides = array<i32>} : memref<3x16x128xf32, #tpu.memory_space<vmem>>, vector<1x16x128xf32>,
    return
  }
  func.func @transform_0(%arg0: i32, %arg1: i32, %arg2: memref<1xi32, #tpu.memory_space<smem>>) -> (i32, i32, i32) {
    %c0_i32 = arith.constant 0 : i32
    %c0_i32_0 = arith.constant 0 : i32
    %c0_i32_1 = arith.constant 0 : i32
    return %arg0, %c0_i32, %c0_i32_0 : i32, i32, i32
  }
  func.func @transform_1(%arg0: i32, %arg1: i32, %arg2: memref<1xi32, #tpu.memory_space<smem>>) -> (i32, i32) {
    %c0_i32 = arith.constant 0 : i32
    %c0_i32_0 = arith.constant 0 : i32
    return %arg1, %c0_i32 : i32, i32
  }
  func.func @transform_2(%arg0: i32, %arg1: i32, %arg2: memref<1xi32, #tpu.memory_space<smem>>) -> (i32, i32, i32) {
    %c0 = arith.constant 0 : index
    %0 = memref.load %arg2[%c0] : memref<1xi32, #tpu.memory_space<smem>>
    %c0_i32 = arith.constant 0 : i32
    %c0_i32_0 = arith.constant 0 : i32
    %c0_i32_1 = arith.constant 0 : i32
    return %0, %c0_i32, %c0_i32_0 : i32, i32, i32
  }
  func.func @transform_3(%arg0: i32, %arg1: i32, %arg2: memref<1xi32, #tpu.memory_space<smem>>) -> (i32, i32, i32) {
    %c0_i32 = arith.constant 0 : i32
    %c0_i32_0 = arith.constant 0 : i32
    return %arg0, %arg1, %c0_i32 : i32, i32, i32
  }
}

</mosaic_0001>

<bundles_post_ra>
// kernel: tpu_custom_call.1
= control target key start
LH: loop header
LB: loop body
LE: loop exit
PB: predicated region body
PF: predicated region fallthrough
CT: control target
= control target key end

     0   :  { %10 = vsyncpa [#allocation5], 0  ;;  %s495_s0 = inlined_call_operand.<no memory space> [shape: s32[1], index: 0, kind: input, shape index: {}]   ;;  %s496_s1 = inlined_call_operand.hbm [shape: u8[3,32,48], index: 1, kind: input, shape index: {}]   ;;  %s497_s2 = inlined_call_operand.hbm [shape: bf16[16,32], index: 2, kind: input, shape index: {}]   ;;  %s498_s3 = inlined_call_operand.hbm [shape: bf16[2,48,128], index: 3, kind: input, shape index: {}]   ;;  %s499_s4 = inlined_call_operand.hbm [shape: f32[3,16,128], index: 4, kind: output, shape index: {}]  }
   0x1   :  { %11 = vsyncpa [#allocation8], 0  ;;  %s30_s17 = sshll.u32 %s497_s2, 4  ;;  %s31_s17 = int_to_ptr.hbm [resolvable:$true] %s30_s17 }
   0x2   :  { %12 = vsyncpa [#allocation6], 0  ;;  %s429_s18 = smov [#allocation7]   ;;  %s17_s22 = sshll.u32 %s496_s1, 4  ;;  %s18_s22 = int_to_ptr.hbm [resolvable:$true] %s17_s22 }
   0x3   :  { %s32_s19 = sshll.u32 %s429_s18, 4  ;;  %s430_s23 = smov 64   ;;  %s33_s19 = int_to_ptr.vmem [resolvable:$true] %s32_s19 }
   0x4   :  { %s431_s24 = smov 4   ;;  %s432_s25 = smov [#allocation4]  }
   0x5   :  { %38 = dma.hbm_to_vmem [thread:$0]  %s31_s17, 128, %s33_s19, [#allocation8], %s430_s23, %s430_s23, %s431_s24  }
   0x6   :  { %s19_s26 = sshll.u32 %s432_s25, 4  ;;  %s433_s2 = smov 128   ;;  %s20_s26 = int_to_ptr.vmem [resolvable:$true] %s19_s26 }
   0x7   :  { %s434_s27 = smov 8   ;;  %s318_s1 = smul.u32 24, %s495_s0 }
   0x8   :  { %25 = dma.hbm_to_vmem [thread:$0]  %s18_s22, 384, %s20_s26, [#allocation5], %s433_s2, %s433_s2, %s434_s27  }
   0x9   :  { %s435_s30 = smov [#allocation9]   ;;  %s46_s8 = scalar_lea.hbm %s498_s3, %s318_s1 }
   0xa   :  { %s49_s5 = sshll.u32 %s435_s30, 4  ;;  %s47_s9 = sshll.u32 %s46_s8, 4  ;;  %s50_s5 = int_to_ptr.vmem [resolvable:$true] %s49_s5  ;;  %s48_s9 = int_to_ptr.hbm [resolvable:$true] %s47_s9 }
   0xb   :  { %s375_s10 = sshra.s32 %s48_s9, 4  ;;  %s379_s14 = scalar_lea.hbm %s498_s3, 48  ;;  %s376_s10 = int_to_ptr.hbm [resolvable:$true] %s375_s10 }
   0xc   :  { %s377_s11 = scalar_lea.hbm %s376_s10, 24  ;;  %p380_p1 = scmp.lt.s32.totalorder %s376_s10, %s498_s3 }
   0xd   :  { %p378_p0 = scmp.ne.s32.totalorder %s376_s10, %s377_s11  ;;  %p381_p2 = scmp.lt.s32.totalorder %s379_s14, %s377_s11 }
   0xf   :  { %p382_p3 = por %p381_p2, %p380_p1 }
  0x11   :  { %p383_p4 = pnand %p382_p3, %p378_p0 }
  0x13   :  { %386 = shalt.err (!%p383_p4)
}
  0x14   :  { %55 = dma.hbm_to_vmem [thread:$0]  %s48_s9, 384, %s50_s5, [#allocation8], %s430_s23, %s430_s23, %s431_s24  }
  0x15   :  { %423 = dma.done.wait [#allocation5], 384  }
  0x16   :  { %424 = vsyncadd [#allocation5], 4294966912 }
  0x17   :  { %425 = dma.done.wait [#allocation8], 512  }
  0x18   :  { %426 = vsyncadd [#allocation8], 4294966784  ;;  %v78_v0 = vld [vmem:[#allocation4] sm:$0xff]  ;;  %v158_v1 = vld [vmem:[#allocation4 + $0x8] sm:$0xff]  ;;  %vm98_vm0 = vcmask 261120   ;;  %vm135_vm1 = vcmask 392192  }
  0x19   :  { %v81_v2 = vunpack.c.2.s8 %v78_v0  ;;  %v82_v3 = vunpack.c.3.s8 %v78_v0  ;;  %v161_v4 = vunpack.c.2.s8 %v158_v1  ;;  %v162_v5 = vunpack.c.3.s8 %v158_v1  ;;  %v211_v18 = vld [vmem:[#allocation4 + $0x10] sm:$0xff]  ;;  %v314_v41 = vld [vmem:[#allocation7] sm:$0xff]  ;;  %v316_v47 = vld [vmem:[#allocation9 + $0x8] sm:$0xff]  ;;  %s436_s0 = smov [#allocation10]   ;;  %s269_s19 = sshll.u32 %s499_s4, 4  ;;  %s270_s19 = int_to_ptr.hbm [resolvable:$true] %s269_s19 }
  0x1a   :  { %v79_v6 = vunpack.c.0.s8 %v78_v0  ;;  %v80_v7 = vunpack.c.1.s8 %v78_v0  ;;  %v159_v8 = vunpack.c.0.s8 %v158_v1  ;;  %v160_v9 = vunpack.c.1.s8 %v158_v1  ;;  %v317_v46 = vld [vmem:[#allocation9 + $0x10] sm:$0xff]  ;;  %v315_v48 = vld [vmem:[#allocation9] sm:$0xff]  ;;  %s267_s3 = sshll.u32 %s436_s0, 4  ;;  %s268_s3 = int_to_ptr.vmem [resolvable:$true] %s267_s3 }
  0x1b   :  { %v85_v10 = vand.u32 255, %v81_v2  ;;  %v86_v11 = vand.u32 255, %v82_v3  ;;  %v165_v12 = vand.u32 255, %v161_v4  ;;  %v166_v13 = vand.u32 255, %v162_v5  ;;  %144 = vmatpush.bf16.msra.mxu1 %v317_v46  ;;  %196 = vmatpush.bf16.msra.mxu3 %v317_v46 }
  0x1c   :  { %v83_v14 = vand.u32 255, %v79_v6  ;;  %v84_v15 = vand.u32 255, %v80_v7  ;;  %v163_v16 = vand.u32 255, %v159_v8  ;;  %v164_v17 = vand.u32 255, %v160_v9 }
  0x1d   :  { %v89_v19 = vcvt.s32.f32 %v85_v10  ;;  %v90_v20 = vcvt.s32.f32 %v86_v11  ;;  %v169_v21 = vcvt.s32.f32 %v165_v12  ;;  %v170_v22 = vcvt.s32.f32 %v166_v13 }
  0x1e   :  { %v87_v23 = vcvt.s32.f32 %v83_v14  ;;  %v88_v24 = vcvt.s32.f32 %v84_v15  ;;  %v167_v25 = vcvt.s32.f32 %v163_v16  ;;  %v168_v26 = vcvt.s32.f32 %v164_v17 }
  0x1f   :  { %v92_v27 = vpack.c.bf16 %v90_v20, %v89_v19  ;;  %v172_v28 = vpack.c.bf16 %v170_v22, %v169_v21  ;;  %v214_v29 = vunpack.c.2.s8 %v211_v18  ;;  %v215_v30 = vunpack.c.3.s8 %v211_v18  ;;  %145 = vmatpush.bf16.msra.mxu1 %v316_v47  ;;  %197 = vmatpush.bf16.msra.mxu3 %v316_v47 }
  0x20   :  { %v212_v31 = vunpack.c.0.s8 %v211_v18  ;;  %v213_v32 = vunpack.c.1.s8 %v211_v18  ;;  %v91_v33 = vpack.c.bf16 %v88_v24, %v87_v23  ;;  %v171_v34 = vpack.c.bf16 %v168_v26, %v167_v25 }
  0x21   :  { %108 = vmatpush.bf16.msra.mxu0 %v92_v27  ;;  %179 = vmatpush.bf16.msra.mxu2 %v172_v28  ;;  %v218_v35 = vand.u32 255, %v214_v29  ;;  %v219_v36 = vand.u32 255, %v215_v30 }
  0x22   :  { %v216_v37 = vand.u32 255, %v212_v31  ;;  %v217_v38 = vand.u32 255, %v213_v32 }
  0x23   :  { %v222_v39 = vcvt.s32.f32 %v218_v35  ;;  %v223_v40 = vcvt.s32.f32 %v219_v36  ;;  %146 = vmatpush.bf16.msra.mxu1 %v315_v48  ;;  %198 = vmatpush.bf16.msra.mxu3 %v315_v48 }
  0x24   :  { %v220_v42 = vcvt.s32.f32 %v216_v37  ;;  %v221_v43 = vcvt.s32.f32 %v217_v38 }
  0x25   :  { %109 = vmatpush.bf16.msra.mxu0 %v91_v33  ;;  %180 = vmatpush.bf16.msra.mxu2 %v171_v34  ;;  %v225_v44 = vpack.c.bf16 %v223_v40, %v222_v39 }
  0x26   :  { %v224_v45 = vpack.c.bf16 %v221_v43, %v220_v42 }
  0x28   :  { %290 = vmatmul.msk.bf16.vlgmr.msra.gmra.mxu0 %vm98_vm0, %v314_v41  ;;  %306 = vmatmul.msk.bf16.vlgmr.msra.gmra.mxu2 %vm98_vm0, %v314_v41 }
  0x29   :  { %232 = vmatpush.bf16.msrb.mxu0 %v225_v44  ;;  %249 = vmatpush.bf16.msrb.mxu2 %v317_v46 }
  0x2d   :  { %233 = vmatpush.bf16.msrb.mxu0 %v224_v45  ;;  %250 = vmatpush.bf16.msrb.mxu2 %v316_v47 }
  0x31   :  { %251 = vmatpush.bf16.msrb.mxu2 %v315_v48 }
  0x38   :  { %310 = vmatmul.msk.bf16.vlgmr.msrb.gmra.mxu0 %vm98_vm0, %v314_v41 }
  0xa5   :  { %v111_v49 = vpop.f32.mrf.mxu0 }
  0xab   :  { %v182_v50 = vpop.f32.mrf.mxu2 }
  0xad   :  { %v113_v51 = vpop.f32.mrf.mxu0 }
  0xae   :  { %v116_v52 = vpack.c.bf16 %v113_v51, %v111_v49 }
  0xb0   :  { %303 = vmatmul.msk.bf16.vlgmr.msra.gmra.mxu1 %vm135_vm1, %v116_v52 }
  0xb3   :  { %v184_v53 = vpop.f32.mrf.mxu2 }
  0xb4   :  { %v187_v54 = vpack.c.bf16 %v184_v53, %v182_v50 }
  0xb5   :  { %v235_v55 = vpop.f32.mrf.mxu0 }
  0xb6   :  { %307 = vmatmul.msk.bf16.vlgmr.msra.gmra.mxu3 %vm135_vm1, %v187_v54 }
  0xbd   :  { %v237_v56 = vpop.f32.mrf.mxu0 }
  0xbe   :  { %v240_v57 = vpack.c.bf16 %v237_v56, %v235_v55 }
  0xc0   :  { %311 = vmatmul.msk.bf16.vlgmr.msrb.gmra.mxu2 %vm135_vm1, %v240_v57 }
 0x12d   :  { %v148_v58 = vpop.f32.mrf.mxu1 }
 0x12e   :  { %v304_v59 = vadd.f32 -1.0, %v148_v58 }
 0x130   :  { %155 = vst [vmem:[#allocation10] sm:$0xff] %v304_v59 }
 0x135   :  { %v150_v60 = vpop.f32.mrf.mxu1 }
 0x136   :  { %v305_v61 = vadd.f32 -1.0, %v150_v60 }
 0x138   :  { %156 = vst [vmem:[#allocation10 + $0x8] sm:$0xff] %v305_v61 }
 0x139   :  { %v200_v62 = vpop.f32.mrf.mxu3 }
 0x13a   :  { %v308_v63 = vadd.f32 -1.0, %v200_v62 }
 0x13c   :  { %208 = vst [vmem:[#allocation10 + $0x10] sm:$0xff] %v308_v63 }
 0x141   :  { %v202_v0 = vpop.f32.mrf.mxu3 }
 0x142   :  { %v309_v1 = vadd.f32 -1.0, %v202_v0 }
 0x143   :  { %v253_v2 = vpop.f32.mrf.mxu2 }
 0x144   :  { %209 = vst [vmem:[#allocation10 + $0x18] sm:$0xff] %v309_v1  ;;  %v312_v3 = vadd.f32 -1.0, %v253_v2 }
 0x146   :  { %261 = vst [vmem:[#allocation10 + $0x20] sm:$0xff] %v312_v3 }
 0x14b   :  { %v255_v4 = vpop.f32.mrf.mxu2 }
 0x14c   :  { %v313_v5 = vadd.f32 -1.0, %v255_v4 }
 0x14e   :  { %262 = vst [vmem:[#allocation10 + $0x28] sm:$0xff] %v313_v5 }
 0x14f   :  { %275 = dma.vmem_to_hbm [thread:$0]  %s268_s3, 768, %s270_s19, [#allocation6], %s433_s2, %s433_s2, %s434_s27  }
 0x150   :  { %427 = dma.done.wait [#allocation6], 768  }
 0x151   :  { %428 = vsyncadd [#allocation6], 4294966528 }
 0x152   :  { %280 = vsyncpa [#allocation5], 1 }
 0x153   :  { %281 = vsyncpa [#allocation8], 1 }
 0x154   :  { %282 = vsyncpa [#allocation6], 1 }

</bundles_post_ra>
